<compile_context>
chip_gen: v7x
topology: tpu7x:2x2x1
jax: 0.10.0
libtpu: 0.0.40
codegen_flags: <defaults>
</compile_context>

<pallas_src>
import jax
import jax.numpy as jnp
from jax.experimental import pallas as pl
from jax.experimental.pallas import tpu as pltpu


def _pooler_kernel(x_ref, w_ref, b_ref, o_ref):
    # x_ref: [tb, H]   token-0 activations
    # w_ref: [tn, H]   PyTorch nn.Linear layout (NOT transposed)
    # b_ref: [1, tn]
    # o_ref: [tb, tn]
    acc = jax.lax.dot_general(
        x_ref[...], w_ref[...],
        dimension_numbers=(((1,), (1,)), ((), ())),   # contract H with H (trans-B)
        preferred_element_type=jnp.float32,
    )                                                 # [tb, tn] f32
    acc = acc + b_ref[...].astype(jnp.float32)        # broadcast over batch
    o_ref[...] = jnp.maximum(acc, 0.0).astype(o_ref.dtype)


def _vmem_capacity_bytes():
    try:
        return int(pltpu.get_tpu_info().vmem_capacity_bytes)
    except Exception:
        return 64 << 20          # conservative fallback: v7x per-TensorCore VMEM


def _shrink(t, align):
    """Roughly halve tile t while keeping it a multiple of align; None if impossible."""
    h = (t // 2 // align) * align
    return h if h >= align else None


def _working_set_bytes(tb, tn, H, itx, itw, ito):
    # Double-buffered blocks (conservative even if the weight ends up single-buffered).
    return 2 * (tb * H * itx + tn * H * itw + tn * 4 + tb * tn * ito)


def _pick_tiles(B, H, BH, itx, itw, ito, budget):
    tb, tn = B, BH
    while _working_set_bytes(tb, tn, H, itx, itw, ito) > budget:
        w_cost = tn * H * itw + tb * tn * ito
        x_cost = tb * H * itx + tb * tn * ito
        cand_tn = _shrink(tn, 128)
        cand_tb = _shrink(tb, 8)
        if cand_tn is not None and (cand_tb is None or w_cost >= x_cost):
            tn = cand_tn
        elif cand_tb is not None:
            tb = cand_tb
        else:
            break                # cannot shrink further while staying aligned
    return tb, tn


@jax.jit
def pooler_forward(hidden_states, weight, bias):
    """hidden_states: [B, S, H]; weight: [BH, H] (PyTorch layout); bias: [BH]."""
    B, S, H = hidden_states.shape
    BH = weight.shape[0]

    itx = hidden_states.dtype.itemsize
    itw = weight.dtype.itemsize
    ito = itx

    vmem_cap = _vmem_capacity_bytes()
    budget = int(vmem_cap * 0.6)
    tb, tn = _pick_tiles(B, H, BH, itx, itw, ito, budget)

    # Guarantee >= 2 parallel grid blocks when possible (v7x has 2 TensorCores).
    if pl.cdiv(BH, tn) * pl.cdiv(B, tb) == 1:
        cand_tn = _shrink(tn, 128)
        cand_tb = _shrink(tb, 8)
        if cand_tn is not None:
            tn = cand_tn
        elif cand_tb is not None:
            tb = cand_tb

    n_blocks = pl.cdiv(BH, tn)
    b_blocks = pl.cdiv(B, tb)

    # Token-0 feed.  Zero-copy reshape when the lane dim stays 128-aligned
    # (or S == 1); otherwise a tiny XLA-side slice.  In both cases the kernel
    # sees a 2-D [*, H] slab whose column-block 0 is token 0 of every row.
    if H % 128 == 0 or S == 1:
        x_in = hidden_states.reshape(B, S * H)     # free reshape, no HBM traffic
    else:
        x_in = hidden_states[:, 0, :]              # fallback: small XLA slice

    b2d = bias.reshape(1, BH)

    # Grid order: keep resident whichever operand would otherwise be re-read more.
    bytes_w = BH * H * itw
    bytes_x = B * H * itx
    traffic_weight_resident = bytes_w + n_blocks * bytes_x     # grid (n, b), b inner
    traffic_act_resident = b_blocks * bytes_w + bytes_x        # grid (b, n), n inner
    weight_resident = traffic_weight_resident <= traffic_act_resident

    if weight_resident:
        grid = (n_blocks, b_blocks)
        x_map = lambda n, b: (b, 0)
        w_map = lambda n, b: (n, 0)
        bias_map = lambda n, b: (0, n)
        o_map = lambda n, b: (b, n)
    else:
        grid = (b_blocks, n_blocks)
        x_map = lambda b, n: (b, 0)
        w_map = lambda b, n: (n, 0)
        bias_map = lambda b, n: (0, n)
        o_map = lambda b, n: (b, n)

    # Resident weight tile never changes along the inner axis -> one pipeline
    # buffer is enough; reclaim the second buffer's VMEM when the tile is big.
    w_spec_kwargs = {}
    if weight_resident and b_blocks > 1 and 2 * tn * H * itw >= (8 << 20):
        w_spec_kwargs["pipeline_mode"] = pl.Buffered(1)

    ws = _working_set_bytes(tb, tn, H, itx, itw, ito)
    vmem_limit = max(32 << 20, min(int(vmem_cap * 0.9), ws + (16 << 20)))

    cost = pl.CostEstimate(
        flops=2 * B * H * BH,
        transcendentals=0,
        bytes_accessed=int(
            min(traffic_weight_resident, traffic_act_resident)
            + BH * bias.dtype.itemsize
            + B * BH * ito
        ),
    )

    return pl.pallas_call(
        _pooler_kernel,
        out_shape=jax.ShapeDtypeStruct((B, BH), hidden_states.dtype),
        grid_spec=pltpu.PrefetchScalarGridSpec(
            num_scalar_prefetch=0,
            grid=grid,
            in_specs=[
                pl.BlockSpec((tb, H), x_map),                 # token-0 slab
                pl.BlockSpec((tn, H), w_map, **w_spec_kwargs),  # un-transposed weight
                pl.BlockSpec((1, tn), bias_map),
            ],
            out_specs=pl.BlockSpec((tb, tn), o_map),
        ),
        compiler_params=pltpu.CompilerParams(
            dimension_semantics=("parallel", "parallel"),
            vmem_limit_bytes=vmem_limit,
        ),
        cost_estimate=cost,
    )(x_in, weight, b2d)


if __name__ == "__main__":
    key = jax.random.PRNGKey(0)

    def run_case(B, S, H, BH, k):
        kx, kw, kb = jax.random.split(k, 3)
        hidden_states = jax.random.normal(kx, (B, S, H), dtype=jnp.float32)
        # nn.Linear(hidden_size, bi_hidden_size) params: W [BH, H], b [BH]
        weight = jax.random.normal(kw, (BH, H), dtype=jnp.float32) * 0.02
        bias = jax.random.normal(kb, (BH,), dtype=jnp.float32) * 0.02

        out = pooler_forward(hidden_states, weight, bias)
        jax.block_until_ready(out)

        ref = jnp.maximum(hidden_states[:, 0, :] @ weight.T + bias, 0.0)
        assert out.shape == (B, BH)
        assert jnp.allclose(out, ref, atol=1e-4, rtol=1e-4)
        return out

    k1, k2 = jax.random.split(key)
    # Primary small config (lane-aligned H): zero-copy reshape token-0 path,
    # >= 2 parallel grid blocks so both v7x TensorCores would be used.
    run_case(B=2, S=8, H=128, BH=256, k=k1)
    # Tiny unaligned config: exercises the XLA-slice fallback path.
    run_case(B=2, S=8, H=32, BH=64, k=k2)

    print("KERNEL_OK")
</pallas_src>

<mosaic_0001>
module attributes {stable_mosaic.version = 11 : i64} {
  func.func @_pooler_kernel(%arg0: i32, %arg1: i32, %arg2: memref<2x128xf32, #tpu.memory_space<vmem>>, %arg3: memref<128x128xf32, #tpu.memory_space<vmem>>, %arg4: memref<1x128xf32, #tpu.memory_space<vmem>>, %arg5: memref<2x128xf32, #tpu.memory_space<vmem>>) attributes {dimension_semantics = [#tpu.dimension_semantics<parallel>, #tpu.dimension_semantics<parallel>], iteration_bounds = array<i64: 1, 2>, scalar_prefetch = 0 : i64, scratch_operands = 0 : i64, tpu.core_type = #tpu.core_type<tc>, window_params = [{transform_indices = @transform_0, window_bounds = array<i64: 2, 128>}, {transform_indices = @transform_1, window_bounds = array<i64: 128, 128>}, {transform_indices = @transform_2, window_bounds = array<i64: 1, 128>}, {transform_indices = @transform_3, window_bounds = array<i64: 2, 128>}]} {
    %c0 = arith.constant 0 : index
    %c0_0 = arith.constant 0 : index
    %0 = vector.load %arg2[%c0, %c0_0] : memref<2x128xf32, #tpu.memory_space<vmem>>, vector<2x128xf32>
    %c0_1 = arith.constant 0 : index
    %c0_2 = arith.constant 0 : index
    %1 = vector.load %arg3[%c0_1, %c0_2] : memref<128x128xf32, #tpu.memory_space<vmem>>, vector<128x128xf32>
    %cst = arith.constant dense<0.000000e+00> : vector<2x128xf32>
    %2 = tpu.matmul %0, %1, %cst {dimension_numbers = #tpu.dot_dimension_numbers<[1], [1], [0], [0], [0, 0, 1, 0], [], []>} : vector<2x128xf32>, vector<128x128xf32>, vector<2x128xf32> -> vector<2x128xf32>
    %c0_3 = arith.constant 0 : index
    %c0_4 = arith.constant 0 : index
    %3 = vector.load %arg4[%c0_3, %c0_4] : memref<1x128xf32, #tpu.memory_space<vmem>>, vector<1x128xf32>
    %4 = vector.broadcast %3 : vector<1x128xf32> to vector<2x128xf32>
    %5 = arith.addf %2, %4 : vector<2x128xf32>
    %cst_5 = arith.constant 0.000000e+00 : f32
    %6 = vector.broadcast %cst_5 : f32 to vector<2x128xf32>
    %7 = arith.maximumf %5, %6 : vector<2x128xf32>
    %c0_6 = arith.constant 0 : index
    %c0_7 = arith.constant 0 : index
    %8 = vector.load %arg5[%c0_6, %c0_7] : memref<2x128xf32, #tpu.memory_space<vmem>>, vector<2x128xf32>
    tpu.vector_store %arg5[%c0_6, %c0_7], %7 {strides = array<i32>} : memref<2x128xf32, #tpu.memory_space<vmem>>, vector<2x128xf32>,
    return
  }
  func.func @transform_0(%arg0: i32, %arg1: i32) -> (i32, i32) {
    %c0_i32 = arith.constant 0 : i32
    %c0_i32_0 = arith.constant 0 : i32
    return %arg0, %c0_i32 : i32, i32
  }
  func.func @transform_1(%arg0: i32, %arg1: i32) -> (i32, i32) {
    %c0_i32 = arith.constant 0 : i32
    %c0_i32_0 = arith.constant 0 : i32
    return %arg1, %c0_i32 : i32, i32
  }
  func.func @transform_2(%arg0: i32, %arg1: i32) -> (i32, i32) {
    %c0_i32 = arith.constant 0 : i32
    %c0_i32_0 = arith.constant 0 : i32
    return %c0_i32, %arg1 : i32, i32
  }
  func.func @transform_3(%arg0: i32, %arg1: i32) -> (i32, i32) {
    %c0_i32 = arith.constant 0 : i32
    return %arg0, %arg1 : i32, i32
  }
}

</mosaic_0001>

<bundles_post_ra>
// kernel: pooler_forward.1
= control target key start
LH: loop header
LB: loop body
LE: loop exit
PB: predicated region body
PF: predicated region fallthrough
CT: control target
= control target key end

     0   :  { %8 = vsyncpa [#allocation3], 0  ;;  %s955_s0 = inlined_call_operand.vmem [shape: f32[2,1024], index: 0, kind: input, shape index: {}]   ;;  %s956_s1 = inlined_call_operand.hbm [shape: f32[256,128], index: 1, kind: input, shape index: {}]   ;;  %s957_s2 = inlined_call_operand.vmem [shape: f32[1,256], index: 2, kind: input, shape index: {}]   ;;  %s958_s3 = inlined_call_operand.hbm [shape: f32[2,256], index: 3, kind: output, shape index: {}]  }
   0x1   :  { %10 = vsyncpa [#allocation3 + $0x1], 0 }
   0x2   :  { %11 = vsyncpa [#allocation4], 0 }
   0x3   :  { %13 = vsyncpa [#allocation4 + $0x1], 0  ;;  %s755_s12 = smov 0   ;;  %s757_s13 = smov 0  }
   0x4   :  { %s759_s14 = smov 0   ;;  %s761_s15 = smov 0  }
   0x5   :  { %s763_s16 = smov 0   ;;  %s765_s17 = smov 0  }
   0x6 LB: > { %s454_s18 = sadd.s32 4294967295, %s726_s17   ;;  %s455_s19 = sadd.s32 4294967294, %s726_s17   ;;  %s726_s17 = sphi %s765_s17, %s19_s17   ;;  %s722_s16 = sphi %s763_s16, %s973_s16   ;;  %s718_s15 = sphi %s761_s15, %s972_s15   ;;  %s714_s14 = sphi %s759_s14, %s971_s14   ;;  %s710_s13 = sphi %s757_s13, %s970_s13   ;;  %s706_s12 = sphi %s755_s12, %s969_s12  }
   0x7   : > { %s28_s20 = sadd.s32 1, %s722_s16  ;;  %s64_s21 = sadd.s32 1, %s714_s14 }
   0x8   : > { %p29_p0 = scmp.ge.s32.totalorder %s28_s20, 2  ;;  %p71_p1 = scmp.ne.s32.totalorder %s714_s14, %s710_s13 }
   0x9   : > { %p72_p2 = scmp.eq.s32.totalorder %s726_s17, 0  ;;  %p77_p3 = scmp.ne.s32.totalorder %s710_s13, %s706_s12 }
   0xa   : > { %s975_s20 = smov (%p29_p0, %s28_s20), 0  ;;  %p78_p5 = scmp.eq.s32.totalorder %s454_s18, 0 }
   0xb   : > { %p796_p4 = por %p72_p2, %p71_p1  ;;  %s61_s23 = ssub.s32 %s722_s16, %s975_s20 }
   0xc   : > { %p129_p6 = scmp.eq.s32.totalorder %s454_s18, 1  ;;  %p62_p7 = scmp.eq.s32.totalorder %s61_s23, 0 }
   0xd   : > { %p802_p8 = por %p78_p5, %p77_p3  ;;  %p135_p10 = scmp.eq.s32.totalorder %s455_s19, 1 }
   0xe   : > { %p806_p9 = por %p129_p6, %p71_p1  ;;  %p559_p13 = scmp.lt.s32.totalorder %s726_s17, 2 }
   0xf   : > { %s811_s26 = scalar_select %p62_p7, %s714_s14, %s64_s21  }
  0x10   : > { %s962_s25 = scalar_select %p806_p9, 1, 0 }
  0x11   : > { %p813_p11 = por %p135_p10, %p77_p3  ;;  %s163_s28 = sand.u32 1, %s714_s14  }
  0x12   : > { %s459_s29 = sshll.u32 %s163_s28, 7  ;;  %s470_s30 = sshll.u32 %s722_s16, 11 }
  0x13   : > { %s963_s27 = scalar_select %p813_p11, 1, 0 }
  0x14   : > { %s824_s6 = scalar_lea.hbm %s956_s1, %s470_s30  ;;  %s167_s7 = scalar_lea.vmem [#allocation2], %s459_s29 }
  0x15   : > { %s174_s8 = sshll.u32 %s167_s7, 4  ;;  %p830_p0 = pnand %p559_p13, %p796_p4  ;;  %s826_s8 = int_to_ptr.vmem [resolvable:$true] %s174_s8 }
  0x16   : > { %s835_s10 = scalar_lea.sflag [#allocation3], %s163_s28  ;;  %s614_s11 = scalar_lea.hbm %s824_s6, 2048 }
  0x17   : > { %p615_p2 = scmp.ne.s32.totalorder %s824_s6, %s614_s11  ;;  %p616_p3 = pneg %p830_p0 }
  0x18   : > { %s619_s21 = scalar_lea.hbm %s956_s1, 4096  ;;  %p620_p4 = scmp.lt.u32.totalorder %s824_s6, %s956_s1 }
  0x19   : > { %p617_p5 = pnand %p616_p3, %p615_p2  ;;  %p621_p7 = scmp.lt.u32.totalorder %s619_s21, %s614_s11 }
  0x1a   : > { %p623_p13 = scmp.lt.u32.totalorder %s614_s11, %s824_s6 }
  0x1b   : > { %p618_p6 = pneg %p617_p5  ;;  %p622_p10 = por %p621_p7, %p620_p4 }
  0x1d   : > { %p624_p12 = por %p623_p13, %p622_p10 }
  0x1f   : > { %p625_p1 = pnand %p624_p12, %p618_p6 }
  0x21   : > { %628 = shalt.err (!%p625_p1)
}
  0x22   : > { %s629_s28 = scalar_lea.vmem %s826_s8, 2048  ;;  %s728_s29 = smov [#allocation2]  }
  0x23   : > { %p630_p2 = scmp.ne.s32.totalorder %s826_s8, %s629_s28  ;;  %s634_s30 = sshll.u32 %s728_s29, 4  ;;  %s635_s30 = int_to_ptr.vmem [resolvable:$false] %s634_s30 }
  0x24   : > { %s636_s4 = scalar_lea.vmem %s635_s30, 4096  ;;  %p637_p9 = scmp.lt.s32.totalorder %s826_s8, %s635_s30 }
  0x25   : > { %p632_p5 = pnand %p630_p2, %p616_p3  ;;  %p638_p4 = scmp.lt.s32.totalorder %s636_s4, %s629_s28 }
  0x27   : > { %p633_p11 = pneg %p632_p5  ;;  %p639_p7 = por %p638_p4, %p637_p9 }
  0x29   : > { %p640_p10 = pnand %p639_p7, %p633_p11 }
  0x2b   : > { %643 = shalt.err (!%p640_p10)
}
  0x2c   : > { %s729_s5 = smov 128   ;;  %s730_s7 = smov 8  }
  0x2d   : > { %554 = dma.hbm_to_vmem [thread:$0]  (!%p830_p0), %s824_s6, 2048, %s826_s8, %s835_s10, %s729_s5, %s729_s5, %s730_s7  }
  0x2e   : > { %p188_p12 = scmp.lt.s32.totalorder %s726_s17, 3  ;;  %p965_p1 = scmp.ge.s32.totalorder %s726_s17, 1 }
  0x30   : > { %p189_p3 = pnand %p965_p1, %p188_p12 }
  0x31   : > { %s867_s11 = sand.u32 (!%p189_p3), 1, %s710_s13  }
  0x32   : > { %192 = sbr.rel (%p189_p3) target bundleno = 354 (0x162), region = 32  ;;  %s463_s18 = sshll.u32 (!%p189_p3), %s867_s11, 7 }
  0x33   : > { %s195_s19 = scalar_lea.sflag (!%p189_p3), [#allocation3], %s867_s11  ;;  %s871_s21 = scalar_lea.vmem (!%p189_p3), [#allocation2], %s463_s18 }
  0x39   : > { %697 = dma.done.wait (%p802_p8), %s195_s19, 2048  }
  0x3a   : > { %699 = vsyncadd (%p802_p8), %s195_s19, 4294965248  ;;  %v731_v0 = vmov 0.0|0.0   ;;  %vm732_vm0 = vmmov 0   ;;  %v733_v1 = vmov 0.0   ;;  %v239_v2 = vld [vmem:[%s871_s21] sm:$0xff]  ;;  %v240_v3 = vld [vmem:[%s871_s21 + $0x8] sm:$0xff] }
  0x3b   : > { %523 = vmatprep.subr.bf16.mxu0 %v731_v0  ;;  %520 = vmatprep.mubr.msk.f32.mxu0 %vm732_vm0, %v733_v1  ;;  %v524_v4 = vpack.c.bf16 %v240_v3, %v239_v2  ;;  %v241_v5 = vld [vmem:[%s871_s21 + $0x10] sm:$0xff]  ;;  %v242_v6 = vld [vmem:[%s871_s21 + $0x18] sm:$0xff]  ;;  %v243_v8 = vld [vmem:[%s871_s21 + $0x20] sm:$0xff]  ;;  %p235_p8 = scmp.lt.s32.totalorder %s718_s15, 1  ;;  %s464_s9 = sshll.u32 %s867_s11, 1 }
  0x3c   : > { %v527_v7 = vpack.c.bf16 %v242_v6, %v241_v5  ;;  %v244_v9 = vld [vmem:[%s871_s21 + $0x28] sm:$0xff]  ;;  %v245_v11 = vld [vmem:[%s871_s21 + $0x30] sm:$0xff]  ;;  %v246_v12 = vld [vmem:[%s871_s21 + $0x38] sm:$0xff]  ;;  %s467_s28 = sshll.u32 %s718_s15, 5  ;;  %s228_s29 = scalar_lea.vmem [#allocation5], %s464_s9 }
  0x3d   : > { %525 = vmatpush3.bf16.xpose.msra.mxu0 %v524_v4  ;;  %v530_v10 = vpack.c.bf16 %v244_v9, %v243_v8  ;;  %v533_v13 = vpack.c.bf16 %v246_v12, %v245_v11  ;;  %v247_v14 = vld [vmem:[%s871_s21 + $0x40] sm:$0xff]  ;;  %v248_v15 = vld [vmem:[%s871_s21 + $0x48] sm:$0xff]  ;;  %v249_v17 = vld [vmem:[%s871_s21 + $0x50] sm:$0xff]  ;;  %s236_s8 = scalar_select %p235_p8, %s718_s15, 1 }
  0x3e   : > { %526 = vmatprep.subr.bf16.mxu0 %v731_v0  ;;  %v536_v16 = vpack.c.bf16 %v248_v15, %v247_v14  ;;  %v250_v18 = vld [vmem:[%s871_s21 + $0x58] sm:$0xff]  ;;  %v251_v20 = vld [vmem:[%s871_s21 + $0x60] sm:$0xff]  ;;  %v252_v21 = vld [vmem:[%s871_s21 + $0x68] sm:$0xff]  ;;  %s350_s30 = sshll.u32 %s228_s29, 4  ;;  %s906_s7 = scalar_lea.hbm %s958_s3, %s467_s28  ;;  %s908_s30 = int_to_ptr.vmem [resolvable:$true] %s350_s30 }
  0x3f   : > { %v539_v19 = vpack.c.bf16 %v250_v18, %v249_v17  ;;  %v542_v22 = vpack.c.bf16 %v252_v21, %v251_v20  ;;  %v253_v23 = vld [vmem:[%s871_s21 + $0x70] sm:$0xff]  ;;  %v254_v24 = vld [vmem:[%s871_s21 + $0x78] sm:$0xff]  ;;  %v238_v26 = vld [vmem:[%s955_s0] sm:$0x3]  ;;  %s237_s23 = scalar_lea.vmem %s957_s2, %s236_s8  ;;  %s335_s18 = scalar_lea.sflag [#allocation4], %s867_s11 }
  0x40   : > { %v545_v25 = vpack.c.bf16 %v254_v24, %v253_v23  ;;  %v465_v27 = vld [vmem:[%s237_s23] ss:$0 sm:$0xff]  ;;  %s644_s19 = scalar_lea.vmem %s908_s30, 32  ;;  %p966_p11 = scmp.ne.s32.totalorder %s962_s25, 0 }
  0x41   : > { %p645_p9 = scmp.ne.s32.totalorder %s908_s30, %s644_s19  ;;  %s734_s15 = smov [#allocation5]  }
  0x42   : > { %s648_s21 = sshll.u32 %s734_s15, 4  ;;  %s649_s21 = int_to_ptr.vmem [resolvable:$false] %s648_s21 }
  0x43   : > { %p646_p0 = pnand %p645_p9, %p966_p11  ;;  %s650_s24 = scalar_lea.vmem %s649_s21, 64 }
  0x44   : > { %p651_p13 = scmp.lt.s32.totalorder %s908_s30, %s649_s21  ;;  %p652_p2 = scmp.lt.s32.totalorder %s650_s24, %s644_s19 }
  0x45   : > { %528 = vmatpush3.bf16.xpose.msra.mxu0 %v527_v7  ;;  %p647_p6 = pneg %p646_p0 }
  0x46   : > { %529 = vmatprep.subr.bf16.mxu0 %v731_v0  ;;  %p653_p5 = por %p652_p2, %p651_p13 }
  0x48   : > { %p654_p4 = pnand %p653_p5, %p647_p6 }
  0x4d   : > { %531 = vmatpush3.bf16.xpose.msra.mxu0 %v530_v10 }
  0x4e   : > { %532 = vmatprep.subr.bf16.mxu0 %v731_v0 }
  0x55   : > { %534 = vmatpush3.bf16.xpose.msra.mxu0 %v533_v13 }
  0x56   : > { %535 = vmatprep.subr.bf16.mxu0 %v731_v0 }
  0x5d   : > { %537 = vmatpush3.bf16.xpose.msra.mxu0 %v536_v16 }
  0x5e   : > { %538 = vmatprep.subr.bf16.mxu0 %v731_v0 }
  0x65   : > { %540 = vmatpush3.bf16.xpose.msra.mxu0 %v539_v19 }
  0x66   : > { %541 = vmatprep.subr.bf16.mxu0 %v731_v0 }
  0x6d   : > { %543 = vmatpush3.bf16.xpose.msra.mxu0 %v542_v22 }
  0x6e   : > { %544 = vmatprep.subr.bf16.mxu0 %v731_v0 }
  0x75   : > { %546 = vmatpush3.bf16.xpose.msra.mxu0 %v545_v25 }
  0x7c   : > { %521 = vmatmul.mubr.f32.vlgmr.msra.gmra.mrb[0].mxu0 %v238_v26 }
 0x14f   : > { %v328_v28 = vpop.f32.mrb[0].mxu0 }
 0x150   : > { %v329_v29 = vadd.f32 %v465_v27, %v328_v28  ;;  %v522_v30 = vpop.f32.mrb[1].mxu0 }
 0x152   : > { %v332_v31 = vmax.f32 %v329_v29, 0.0 }
 0x154   : > { %333 = vst [vmem:[%s228_s29] sm:$0x3] %v332_v31 }
 0x155   : > { %657 = shalt.err (!%p654_p4)
}
 0x156   : > { %s658_s11 = scalar_lea.hbm %s906_s7, 32  ;;  %s662_s9 = scalar_lea.hbm %s958_s3, 64 }
 0x157   : > { %p659_p7 = scmp.ne.s32.totalorder %s906_s7, %s658_s11  ;;  %p663_p1 = scmp.lt.u32.totalorder %s906_s7, %s958_s3 }
 0x158   : > { %p664_p3 = scmp.lt.u32.totalorder %s662_s9, %s658_s11  ;;  %p666_p9 = scmp.lt.u32.totalorder %s658_s11, %s906_s7 }
 0x159   : > { %p660_p10 = pnand %p659_p7, %p966_p11 }
 0x15a   : > { %p665_p8 = por %p664_p3, %p663_p1 }
 0x15b   : > { %p661_p12 = pneg %p660_p10 }
 0x15c   : > { %p667_p0 = por %p666_p9, %p665_p8 }
 0x15e   : > { %p668_p6 = pnand %p667_p0, %p661_p12 }
 0x160   : > { %671 = shalt.err (!%p668_p6)
}
 0x161   : > { %549 = dma.vmem_to_hbm [thread:$0]  (%p966_p11), %s908_s30, 32, %s906_s7, %s335_s18  }
 0x162 PF: > { %s362_s23 = sand.u32 1, %s706_s12   ;;  %p967_p13 = scmp.ne.s32.totalorder %s963_s27, 0 }
 0x163   : > { %p968_p2 = scmp.ge.s32.totalorder %s726_s17, 2  ;;  %s363_s28 = scalar_lea.sflag [#allocation4], %s362_s23 }
 0x165   : > { %p556_p5 = pnand %p968_p2, %p967_p13 }
 0x167   : > { %701 = dma.done.wait (!%p556_p5), %s363_s28, 32  }
 0x168   : > { %703 = vsyncadd (!%p556_p5), %s363_s28, 4294967264  ;;  %s19_s17 = sadd.s32 1, %s726_s17   ;;  %s969_s12 = smov %s710_s13 }
 0x169   : > { %p16_p4 = scmp.ge.s32.totalorder %s19_s17, 4   ;;  %s970_s13 = smov %s714_s14 }
 0x16a   : > { %s971_s14 = smov %s811_s26  ;;  %s972_s15 = smov %s722_s16 }
 0x16b   : > { %s973_s16 = smov %s975_s20  ;;  %18 = sbr.rel (!%p16_p4) target bundleno = 6 (0x6), region = 83 }
 0x172   :  { %368 = vsyncpa [#allocation3], 1 }
 0x173   :  { %370 = vsyncpa [#allocation3 + $0x1], 1 }
 0x174   :  { %371 = vsyncpa [#allocation4], 1 }
 0x175   :  { %373 = vsyncpa [#allocation4 + $0x1], 1 }

</bundles_post_ra>
